<compile_context>
chip_gen: v5e
topology: v5e:2x2
jax: 0.10.0
libtpu: 0.0.40
codegen_flags: <defaults>
</compile_context>

<pallas_src>
import functools

import jax
import jax.numpy as jnp
from jax import lax
from jax.experimental import pallas as pl
from jax.experimental.pallas import tpu as pltpu


def _poscnn1d_kernel(x_ref, w_ref, b_ref, o_ref, *, add_residual, stride):
    """One (channel-tile, batch-tile) block per grid step.

    x_ref : (TB, N, TC)      input block, channels lane-dense
    w_ref : (3, TC)          depthwise conv taps, tap index on sublanes
    b_ref : (1, TC)          bias
    o_ref : (TB, N_out, TC)  output block
    """
    tb, n, tc = x_ref.shape
    n_out = o_ref.shape[1]

    # Parameter rows broadcast over (TB, N, TC); hoisted once per body.
    w0 = w_ref[0:1, :].astype(jnp.float32)   # x[i-1] tap, shape (1, TC)
    w1 = w_ref[1:2, :].astype(jnp.float32)   # x[i]   tap
    w2 = w_ref[2:3, :].astype(jnp.float32)   # x[i+1] tap
    b = b_ref[...].astype(jnp.float32)       # (1, TC)

    zero_row = jnp.zeros((tb, 1, tc), jnp.float32)

    if stride == 1:
        x = x_ref[...].astype(jnp.float32)                       # (TB, N, TC), f32 acc path
        # +/-1 taps via static slice + zero-row concat (zero padding at the ends).
        x_prev = jnp.concatenate([zero_row, x[:, : n - 1, :]], axis=1)
        x_next = jnp.concatenate([x[:, 1:, :], zero_row], axis=1)
        acc = w0 * x_prev + w1 * x + w2 * x_next + b
        if add_residual:
            acc = acc + x                    # residual == centre tap (no extra DMA)
        o_ref[...] = acc.astype(o_ref.dtype)
        return

    # stride != 1: compute only the n_out output rows; taps are strided reads
    # straight from the input ref (no full-size scratch / extra vst pass).
    x_c = x_ref[:, pl.ds(0, n_out, stride=stride), :].astype(jnp.float32)
    if n_out > 1:
        p_tail = x_ref[:, pl.ds(stride - 1, n_out - 1, stride=stride), :]
        x_prev = jnp.concatenate([zero_row, p_tail.astype(jnp.float32)], axis=1)
    else:
        x_prev = zero_row
    if stride * (n_out - 1) + 1 <= n - 1:    # last "next" tap in range -> single read
        x_next = x_ref[:, pl.ds(1, n_out, stride=stride), :].astype(jnp.float32)
    elif n_out > 1:
        n_head = x_ref[:, pl.ds(1, n_out - 1, stride=stride), :]
        x_next = jnp.concatenate([n_head.astype(jnp.float32), zero_row], axis=1)
    else:
        x_next = zero_row
    acc = w0 * x_prev + w1 * x_c + w2 * x_next + b   # no residual when stride != 1
    o_ref[...] = acc.astype(o_ref.dtype)


def _hw_budgets():
    """(input-block budget, scoped-VMEM ceiling) in bytes, per TPU generation."""
    vmem_phys = 128 << 20
    try:
        info = pltpu.get_tpu_info()
        vmem_phys = int(getattr(info, "vmem_capacity_bytes", vmem_phys))
    except Exception:  # non-TPU backend / interpret mode: assume v5e/v6e-class
        pass
    if vmem_phys <= (64 << 20):          # v7x-class: 64 MiB VMEM per TensorCore
        return 3 << 20, 48 << 20
    return 6 << 20, 96 << 20             # v5e / v6e: 128 MiB VMEM


def _pick_tiles(B, N, C, itemsize, s, budget):
    """Channel tile tc (128-aligned divisor of C, or full C) and batch tile tb."""
    if C % 128 != 0 or N * C * itemsize <= budget:
        # A non-128-multiple lane dim can only be blocked at its full extent;
        # otherwise prefer tc == C (one contiguous DMA per batch block).
        tc = C
    else:
        tc = 128
        cand = 256
        while cand <= C:
            if C % cand == 0 and N * cand * itemsize <= budget:
                tc = cand
            cand += 128
    # Pack batch rows while the block stays within budget (stride path keeps tb=1).
    tb = 1
    if s == 1:
        for d in range(2, B + 1):
            if B % d == 0 and d * N * tc * itemsize <= budget:
                tb = d
    # Keep >= 2 grid programs whenever splittable (v7x has 2 TensorCores).
    if (C // tc) * (B // tb) < 2:
        if B >= 2:
            tb = max(d for d in range(1, B // 2 + 1) if B % d == 0)
        elif tc == C and C % 256 == 0:
            tc = C // 2
    return tc, tb


def poscnn1d_forward(x, weight, bias, s=1):
    """x: (B, N, C); weight: (C, 1, 3) depthwise; bias: (C,). Returns (B, N_out, C)."""
    B, N, C = x.shape
    n_out = (N - 1) // s + 1                      # conv1d(k=3, pad=1, stride=s)
    itemsize = jnp.dtype(x.dtype).itemsize
    budget, vmem_ceiling = _hw_budgets()
    tc, tb = _pick_tiles(B, N, C, itemsize, s, budget)

    # Tiny parameter re-layout: (3, C) / (1, C) so channels stay lane-dense.
    w_t = jnp.transpose(weight.reshape(C, 3), (1, 0))
    b_t = bias.reshape(1, C)

    # VMEM estimate: double-buffered in/out blocks + in-kernel f32 temporaries
    # (centre/prev/next taps + accumulator ~ 5 blocks) + slack.
    elems_in = tb * N * tc
    elems_out = tb * n_out * tc
    temp_elems = 5 * (elems_in if s == 1 else elems_out)
    est = (2 * elems_in + 2 * elems_out) * itemsize + temp_elems * 4 + (2 << 20)
    vmem_limit = int(min(vmem_ceiling, max(est, 16 << 20)))

    grid = (C // tc, B // tb)                     # channels outer, batch inner:
                                                  # w/b blocks change only on the outer axis
    return pl.pallas_call(
        functools.partial(_poscnn1d_kernel, add_residual=(s == 1), stride=s),
        grid=grid,
        in_specs=[
            pl.BlockSpec((tb, N, tc), lambda c, b: (b, 0, c)),
            pl.BlockSpec((3, tc), lambda c, b: (0, c)),
            pl.BlockSpec((1, tc), lambda c, b: (0, c)),
        ],
        out_specs=pl.BlockSpec((tb, n_out, tc), lambda c, b: (b, 0, c)),
        out_shape=jax.ShapeDtypeStruct((B, n_out, C), x.dtype),
        compiler_params=pltpu.CompilerParams(
            dimension_semantics=("parallel", "parallel"),
            vmem_limit_bytes=vmem_limit,
        ),
    )(x, w_t, b_t)


def _reference(x, weight, bias, s=1):
    """Independent XLA reference (lax depthwise conv)."""
    B, N, C = x.shape
    xc = jnp.transpose(x, (0, 2, 1))              # (B, C, N)
    y = lax.conv_general_dilated(
        xc, weight, window_strides=(s,), padding=((1, 1),),
        dimension_numbers=("NCH", "OIH", "NCH"),
        feature_group_count=C,
    ) + bias[None, :, None]
    if s == 1:
        y = y + xc
    return jnp.transpose(y, (0, 2, 1))


if __name__ == "__main__":
    # Small shapes consistent with the module (N a perfect square; depthwise
    # conv implies in_chans == embed_dim == C).
    B, N, C = 2, 16, 32

    key = jax.random.PRNGKey(0)
    kx, kw, kb = jax.random.split(key, 3)
    x = jax.random.normal(kx, (B, N, C), dtype=jnp.float32)

    bound = 1.0 / (3 ** 0.5)   # Conv1d(C, C, 3, groups=C): fan_in = 1 * 3
    weight = jax.random.uniform(kw, (C, 1, 3), minval=-bound, maxval=bound,
                                dtype=jnp.float32)
    bias = jax.random.uniform(kb, (C,), minval=-bound, maxval=bound,
                              dtype=jnp.float32)

    # s == 1 (default CPVT config): conv + residual.
    out1 = jax.block_until_ready(poscnn1d_forward(x, weight, bias, s=1))
    ref1 = _reference(x, weight, bias, s=1)
    assert out1.shape == ref1.shape == (B, N, C)
    assert jnp.allclose(out1, ref1, atol=1e-5, rtol=1e-5), "s=1 mismatch vs XLA reference"

    # s == 2: strided conv, no residual, taps read with strided pl.ds windows.
    out2 = jax.block_until_ready(poscnn1d_forward(x, weight, bias, s=2))
    ref2 = _reference(x, weight, bias, s=2)
    assert out2.shape == ref2.shape == (B, (N - 1) // 2 + 1, C)
    assert jnp.allclose(out2, ref2, atol=1e-5, rtol=1e-5), "s=2 mismatch vs XLA reference"

    print("KERNEL_OK")
</pallas_src>

<mosaic_0001>
module attributes {stable_mosaic.version = 11 : i64} {
  func.func @_poscnn1d_kernel(%arg0: i32, %arg1: i32, %arg2: memref<1x16x32xf32, #tpu.memory_space<vmem>>, %arg3: memref<3x32xf32, #tpu.memory_space<vmem>>, %arg4: memref<1x32xf32, #tpu.memory_space<vmem>>, %arg5: memref<1x16x32xf32, #tpu.memory_space<vmem>>) attributes {dimension_semantics = [#tpu.dimension_semantics<parallel>, #tpu.dimension_semantics<parallel>], iteration_bounds = array<i64: 1, 2>, scalar_prefetch = 0 : i64, scratch_operands = 0 : i64, tpu.core_type = #tpu.core_type<tc>, window_params = [{transform_indices = @transform_0, window_bounds = array<i64: 1, 16, 32>}, {transform_indices = @transform_1, window_bounds = array<i64: 3, 32>}, {transform_indices = @transform_2, window_bounds = array<i64: 1, 32>}, {transform_indices = @transform_3, window_bounds = array<i64: 1, 16, 32>}]} {
    %c0 = arith.constant 0 : index
    %c0_0 = arith.constant 0 : index
    %0 = vector.load %arg3[%c0, %c0_0] : memref<3x32xf32, #tpu.memory_space<vmem>>, vector<1x32xf32>
    %c1 = arith.constant 1 : index
    %c0_1 = arith.constant 0 : index
    %1 = vector.load %arg3[%c1, %c0_1] : memref<3x32xf32, #tpu.memory_space<vmem>>, vector<1x32xf32>
    %c2 = arith.constant 2 : index
    %c0_2 = arith.constant 0 : index
    %2 = vector.load %arg3[%c2, %c0_2] : memref<3x32xf32, #tpu.memory_space<vmem>>, vector<1x32xf32>
    %c0_3 = arith.constant 0 : index
    %c0_4 = arith.constant 0 : index
    %3 = vector.load %arg4[%c0_3, %c0_4] : memref<1x32xf32, #tpu.memory_space<vmem>>, vector<1x32xf32>
    %cst = arith.constant 0.000000e+00 : f32
    %4 = vector.broadcast %cst : f32 to vector<1x1x32xf32>
    %c0_5 = arith.constant 0 : index
    %c0_6 = arith.constant 0 : index
    %c0_7 = arith.constant 0 : index
    %5 = vector.load %arg2[%c0_5, %c0_6, %c0_7] : memref<1x16x32xf32, #tpu.memory_space<vmem>>, vector<1x16x32xf32>
    %6 = vector.extract_strided_slice %5 {offsets = [0, 0, 0], sizes = [1, 15, 32], strides = [1, 1, 1]} : vector<1x16x32xf32> to vector<1x15x32xf32>
    %7 = tpu.concatenate %4, %6 in 1 : vector<1x1x32xf32>, vector<1x15x32xf32> -> vector<1x16x32xf32>
    %8 = vector.extract_strided_slice %5 {offsets = [0, 1, 0], sizes = [1, 15, 32], strides = [1, 1, 1]} : vector<1x16x32xf32> to vector<1x15x32xf32>
    %9 = tpu.concatenate %8, %4 in 1 : vector<1x15x32xf32>, vector<1x1x32xf32> -> vector<1x16x32xf32>
    %10 = vector.shape_cast %0 : vector<1x32xf32> to vector<1x1x32xf32>
    %11 = vector.broadcast %10 : vector<1x1x32xf32> to vector<1x16x32xf32>
    %12 = arith.mulf %11, %7 : vector<1x16x32xf32>
    %13 = vector.shape_cast %1 : vector<1x32xf32> to vector<1x1x32xf32>
    %14 = vector.broadcast %13 : vector<1x1x32xf32> to vector<1x16x32xf32>
    %15 = arith.mulf %14, %5 : vector<1x16x32xf32>
    %16 = arith.addf %12, %15 : vector<1x16x32xf32>
    %17 = vector.shape_cast %2 : vector<1x32xf32> to vector<1x1x32xf32>
    %18 = vector.broadcast %17 : vector<1x1x32xf32> to vector<1x16x32xf32>
    %19 = arith.mulf %18, %9 : vector<1x16x32xf32>
    %20 = arith.addf %16, %19 : vector<1x16x32xf32>
    %21 = vector.shape_cast %3 : vector<1x32xf32> to vector<1x1x32xf32>
    %22 = vector.broadcast %21 : vector<1x1x32xf32> to vector<1x16x32xf32>
    %23 = arith.addf %20, %22 : vector<1x16x32xf32>
    %24 = arith.addf %23, %5 : vector<1x16x32xf32>
    %c0_8 = arith.constant 0 : index
    %c0_9 = arith.constant 0 : index
    %c0_10 = arith.constant 0 : index
    %25 = vector.load %arg5[%c0_8, %c0_9, %c0_10] : memref<1x16x32xf32, #tpu.memory_space<vmem>>, vector<1x16x32xf32>
    tpu.vector_store %arg5[%c0_8, %c0_9, %c0_10], %24 {strides = array<i32>} : memref<1x16x32xf32, #tpu.memory_space<vmem>>, vector<1x16x32xf32>,
    return
  }
  func.func @transform_0(%arg0: i32, %arg1: i32) -> (i32, i32, i32) {
    %c0_i32 = arith.constant 0 : i32
    %c0_i32_0 = arith.constant 0 : i32
    return %arg1, %c0_i32, %arg0 : i32, i32, i32
  }
  func.func @transform_1(%arg0: i32, %arg1: i32) -> (i32, i32) {
    %c0_i32 = arith.constant 0 : i32
    %c0_i32_0 = arith.constant 0 : i32
    return %c0_i32, %arg0 : i32, i32
  }
  func.func @transform_2(%arg0: i32, %arg1: i32) -> (i32, i32) {
    %c0_i32 = arith.constant 0 : i32
    %c0_i32_0 = arith.constant 0 : i32
    return %c0_i32, %arg0 : i32, i32
  }
  func.func @transform_3(%arg0: i32, %arg1: i32) -> (i32, i32, i32) {
    %c0_i32 = arith.constant 0 : i32
    %c0_i32_0 = arith.constant 0 : i32
    return %arg1, %c0_i32, %arg0 : i32, i32, i32
  }
}

</mosaic_0001>

<bundles_post_ra>
// kernel: tpu_custom_call.1
= control target key start
LH: loop header
LB: loop body
LE: loop exit
PB: predicated region body
PF: predicated region fallthrough
CT: control target
= control target key end

     0   :  { %s847_s0 = inlined_call_operand.hbm [shape: f32[2,16,32], index: 0, kind: input, shape index: {}]   ;;  %s848_s1 = inlined_call_operand.hbm [shape: f32[3,32], index: 1, kind: input, shape index: {}]   ;;  %s849_s2 = inlined_call_operand.vmem [shape: f32[1,32], index: 2, kind: input, shape index: {}]   ;;  %s850_s3 = inlined_call_operand.hbm [shape: f32[2,16,32], index: 3, kind: output, shape index: {}]  }
   0x1   :  { %851 = sst [smem:[#allocation11_spill]] %s848_s1 }
   0x2   :  { %8 = vsyncpa [#allocation3], 0 }
   0x3   :  { %10 = vsyncpa [#allocation3 + $0x1], 0 }
   0x4   :  { %11 = vsyncpa [#allocation6], 0 }
   0x5   :  { %12 = vsyncpa [#allocation4], 0 }
   0x6   :  { %14 = vsyncpa [#allocation4 + $0x1], 0  ;;  %s689_s12 = smov 0   ;;  %s691_s13 = smov 0  }
   0x7   :  { %s693_s14 = smov 0   ;;  %s695_s15 = smov 0  }
   0x8   :  { %s697_s16 = smov 0   ;;  %s699_s17 = smov 0  }
   0x9 LB: > { %s415_s18 = sadd.s32 4294967295, %s662_s17   ;;  %s416_s19 = sadd.s32 4294967294, %s662_s17   ;;  %s662_s17 = sphi %s699_s17, %s20_s17   ;;  %s658_s16 = sphi %s697_s16, %s864_s16   ;;  %s654_s15 = sphi %s695_s15, %s863_s15   ;;  %s650_s14 = sphi %s693_s14, %s862_s14   ;;  %s646_s13 = sphi %s691_s13, %s861_s13   ;;  %s642_s12 = sphi %s689_s12, %s860_s12  }
   0xa   : > { %s41_s20 = sadd.s32 1, %s650_s14  ;;  %p48_p0 = scmp.ne.s32.totalorder %s650_s14, %s646_s13 }
   0xb   : > { %p49_p1 = scmp.eq.s32.totalorder %s662_s17, 0  ;;  %p54_p2 = scmp.ne.s32.totalorder %s646_s13, %s642_s12 }
   0xc   : > { %p727_p3 = scmp.eq.s32.totalorder %s415_s18, 0  ;;  %p132_p4 = scmp.eq.s32.totalorder %s415_s18, 1 }
   0xd   : > { %p731_p5 = por %p49_p1, %p48_p0  ;;  %p138_p6 = scmp.eq.s32.totalorder %s416_s19, 1 }
   0xe   : > { %p737_p7 = por %p727_p3, %p54_p2  ;;  %p741_p8 = por %p132_p4, %p48_p0 }
   0xf   : > { %p745_p9 = por %p138_p6, %p54_p2  ;;  %p417_p10 = scmp.ge.s32.totalorder %s662_s17, 1 }
  0x10   : > { %p145_p11 = scmp.lt.s32.totalorder %s662_s17, 3  ;;  %s857_s1 = sld [smem:[#allocation11_spill]] }
  0x11   : > { %s664_s30 = smov [#allocation5]   ;;  %p420_p13 = scmp.ge.s32.totalorder %s662_s17, 2 }
  0x12   : > { %p754_p12 = pnand %p417_p10, %p145_p11  ;;  %s161_s4 = sshll.u32 %s664_s30, 4  ;;  %s162_s4 = int_to_ptr.vmem [resolvable:$true] %s161_s4 }
  0x13   : > { %p456_p1 = scmp.lt.s32.totalorder %s662_s17, 2  ;;  %s29_s6 = sadd.s32 1, %s658_s16 }
  0x14   : > { %p443_p0 = pneg %p754_p12  ;;  %p30_p6 = scmp.ge.s32.totalorder %s29_s6, 2 }
  0x15   : > { %p766_p4 = pnand %p456_p1, %p731_p5  ;;  %s178_s7 = sand.u32 1, %s650_s14  }
  0x16   : > { %s159_s28 = sshll.u32 %s857_s1, 4  ;;  %p444_p2 = pnand %p443_p0, %p727_p3  ;;  %s160_s28 = int_to_ptr.hbm [resolvable:$true] %s159_s28 }
  0x17   : > { %s866_s6 = smov (%p30_p6, %s29_s6), 0  ;;  %s421_s8 = sshll.u32 %s178_s7, 4 }
  0x18   : > { %446 = dma.hbm_to_vmem [thread:$0]  (!%p444_p2), %s160_s28, 64, %s162_s4, [#allocation6]  }
  0x19   : > { %s36_s9 = ssub.s32 %s658_s16, %s866_s6  ;;  %s433_s10 = sshll.u32 %s658_s16, 4 }
  0x1a   : > { %p39_p10 = scmp.eq.s32.totalorder %s36_s9, 0  ;;  %s188_s19 = scalar_lea.hbm %s847_s0, %s433_s10 }
  0x1b   : > { %s182_s22 = scalar_lea.vmem [#allocation2], %s421_s8  ;;  %s189_s30 = sshll.u32 %s188_s19, 4  ;;  %s190_s30 = int_to_ptr.hbm [resolvable:$true] %s189_s30 }
  0x1c   : > { %s191_s26 = sshll.u32 %s182_s22, 4  ;;  %s179_s28 = scalar_lea.sflag [#allocation3], %s178_s7  ;;  %s192_s26 = int_to_ptr.vmem [resolvable:$true] %s191_s26 }
  0x1d   : > { %s783_s27 = scalar_select %p39_p10, %s650_s14, %s41_s20  }
  0x1e   : > { %s665_s4 = smov 128   ;;  %s666_s1 = smov 8  }
  0x1f   : > { %450 = dma.hbm_to_vmem [thread:$0]  (!%p766_p4), %s190_s30, 256, %s192_s26, %s179_s28, %s665_s4, %s665_s4, %s666_s1  }
  0x20   : > { %203 = sbr.rel (%p754_p12) target bundleno = 59 (0x3b), region = 32  ;;  %s790_s9 = sand.u32 (!%p754_p12), 1, %s646_s13  }
  0x21   : > { %s425_s20 = sshll.u32 (!%p754_p12), %s790_s9, 4  ;;  %s206_s8 = scalar_lea.sflag (!%p754_p12), [#allocation3], %s790_s9 }
  0x22   : > { %s209_s10 = scalar_lea.vmem (!%p754_p12), [#allocation2], %s425_s20 }
  0x25   : > { %629 = dma.done.wait (%p737_p7), %s206_s8, 256  }
  0x26   : > { %631 = vsyncadd (%p737_p7), %s206_s8, 4294967040 }
  0x27   : > { %633 = dma.done.wait (%p727_p3), [#allocation6], 64  }
  0x28   : > { %635 = vsyncadd (%p727_p3), [#allocation6], 4294967232  ;;  %v248_v0 = vld [vmem:[%s209_s10] sm:$0xff]  ;;  %v249_v1 = vld [vmem:[%s209_s10 + $0x8] sm:$0xff]  ;;  %vm252_vm0 = vcmask 1040384   ;;  %vm259_vm1 = vcmask 1046528  }
  0x29   : > { %v253_v2 = vrot.slane %v248_v0, 7  ;;  %v260_v3 = vrot.slane %v248_v0, 1  ;;  %v261_v4 = vrot.slane %v249_v1, 1  ;;  %v512_v5 = vld [vmem:[#allocation5] ss:$0 sm:$0xff]  ;;  %v254_v6 = vrot.slane %v249_v1, 7 }
  0x2a   : > { %v513_v7 = vld [vmem:[#allocation5 + $0x1] ss:$0 sm:$0xff]  ;;  %v514_v8 = vld [vmem:[#allocation5 + $0x2] ss:$0 sm:$0xff]  ;;  %s434_s1 = sshll.u32 %s654_s15, 4  ;;  %s240_s11 = scalar_lea.vmem [#allocation7], %s425_s20 }
  0x2b   : > { %v258_v9 = vsel %vm252_vm0, 0.0, %v253_v2  ;;  %v262_v10 = vsel %vm259_vm1, %v260_v3, %v261_v4  ;;  %v255_v11 = vsel %vm252_vm0, %v253_v2, %v254_v6  ;;  %v265_v12 = vsel %vm259_vm1, %v261_v4, 0.0  ;;  %v515_v20 = vld [vmem:[%s849_s2] ss:$0 sm:$0xff]  ;;  %s302_s7 = scalar_lea.hbm %s850_s3, %s434_s1  ;;  %s303_s18 = sshll.u32 %s240_s11, 4  ;;  %s304_s18 = int_to_ptr.vmem [resolvable:$true] %s303_s18 }
  0x2c   : > { %v267_v13 = vmul.f32 %v512_v5, %v258_v9  ;;  %v270_v14 = vmul.f32 %v513_v7, %v248_v0  ;;  %v275_v15 = vmul.f32 %v514_v8, %v262_v10  ;;  %v268_v16 = vmul.f32 %v512_v5, %v255_v11  ;;  %s305_s15 = sshll.u32 %s302_s7, 4  ;;  %s290_s19 = scalar_lea.sflag [#allocation4], %s790_s9  ;;  %s306_s15 = int_to_ptr.hbm [resolvable:$true] %s305_s15 }
  0x2d   : > { %v271_v17 = vmul.f32 %v513_v7, %v249_v1  ;;  %v276_v18 = vmul.f32 %v514_v8, %v265_v12  ;;  %vm286_vm2 = vcmask 261120   ;;  %s590_s22 = sshra.s32 %s306_s15, 4  ;;  %s596_s4 = scalar_lea.hbm %s850_s3, 32  ;;  %s591_s22 = int_to_ptr.hbm [resolvable:$true] %s590_s22 }
  0x2e   : > { %v272_v19 = vadd.f32 %v270_v14, %v267_v13  ;;  %s592_s26 = scalar_lea.hbm %s591_s22, 16  ;;  %p597_p11 = scmp.lt.s32.totalorder %s591_s22, %s850_s3 }
  0x2f   : > { %v273_v21 = vadd.f32 %v271_v17, %v268_v16  ;;  %p593_p3 = scmp.ne.s32.totalorder %s591_s22, %s592_s26  ;;  %p598_p12 = scmp.lt.s32.totalorder %s596_s4, %s592_s26 }
  0x30   : > { %v277_v22 = vadd.f32 %v275_v15, %v272_v19 }
  0x31   : > { %v278_v23 = vadd.f32 %v276_v18, %v273_v21  ;;  %p594_p5 = pnand %p593_p3, %p741_p8  ;;  %p599_p0 = por %p598_p12, %p597_p11 }
  0x32   : > { %v282_v24 = vadd.f32 %v515_v20, %v277_v22 }
  0x33   : > { %v283_v25 = vadd.f32 %v515_v20, %v278_v23  ;;  %p595_p7 = pneg %p594_p5 }
  0x34   : > { %v284_v26 = vadd.f32 %v282_v24, %v248_v0 }
  0x35   : > { %v285_v27 = vadd.f32 %v283_v25, %v249_v1  ;;  %p600_p1 = pnand %p599_p0, %p595_p7 }
  0x36   : > { %287 = vst.msk [vmem:[%s240_s11] sm:$0xff] %vm286_vm2, %v284_v26 }
  0x37   : > { %288 = vst.msk [vmem:[%s240_s11 + $0x8] sm:$0xff] %vm286_vm2, %v285_v27 }
  0x38   : > { %603 = shalt.err (!%p600_p1)
}
  0x39   : > { %s667_s9 = smov 128   ;;  %s668_s10 = smov 8  }
  0x3a   : > { %441 = dma.vmem_to_hbm [thread:$0]  (%p741_p8), %s304_s18, 256, %s306_s15, %s290_s19, %s667_s9, %s667_s9, %s668_s10  }
  0x3b PF: > { %s320_s1 = sand.u32 1, %s642_s12   ;;  %p452_p2 = pnand %p420_p13, %p745_p9 }
  0x3c   : > { %s321_s21 = scalar_lea.sflag [#allocation4], %s320_s1 }
  0x3d   : > { %p453_p4 = pneg %p452_p2 }
  0x3f   : > { %637 = dma.done.wait (%p453_p4), %s321_s21, 256  }
  0x40   : > { %639 = vsyncadd (%p453_p4), %s321_s21, 4294967040  ;;  %s20_s17 = sadd.s32 1, %s662_s17   ;;  %s860_s12 = smov %s646_s13 }
  0x41   : > { %p17_p6 = scmp.ge.s32.totalorder %s20_s17, 4   ;;  %s861_s13 = smov %s650_s14 }
  0x42   : > { %s862_s14 = smov %s783_s27  ;;  %s863_s15 = smov %s658_s16 }
  0x43   : > { %s864_s16 = smov %s866_s6  ;;  %19 = sbr.rel (!%p17_p6) target bundleno = 9 (0x9), region = 85 }
  0x48   :  { %327 = vsyncpa [#allocation3], 1 }
  0x49   :  { %329 = vsyncpa [#allocation3 + $0x1], 1 }
  0x4a   :  { %330 = vsyncpa [#allocation6], 1 }
  0x4b   :  { %331 = vsyncpa [#allocation4], 1 }
  0x4c   :  { %333 = vsyncpa [#allocation4 + $0x1], 1 }

</bundles_post_ra>
